<compile_context>
chip_gen: v7x
topology: tpu7x:2x2x1
jax: 0.10.0
libtpu: 0.0.40
codegen_flags: <defaults>
</compile_context>

<pallas_src>
import jax
import jax.numpy as jnp
from jax.experimental import pallas as pl
from jax.experimental.pallas import tpu as pltpu


def _round_up(x, m):
    return (x + m - 1) // m * m


def cln_kernel(s_ref, a_ref, w1s_ref, w1a_ref, b1_ref, w2_ref, b2_ref,
               w3_ref, b3_ref, out_ref):
    # Layer 1: split matmul avoids any concat; bf16 operands, f32 accumulation.
    s = s_ref[...].astype(jnp.bfloat16)
    a = a_ref[...].astype(jnp.bfloat16)
    h1 = (jnp.dot(s, w1s_ref[...], preferred_element_type=jnp.float32)
          + jnp.dot(a, w1a_ref[...], preferred_element_type=jnp.float32)
          + b1_ref[...])
    h1 = jnp.maximum(h1, 0.0)

    # Layer 2: MXU bf16 matmul, f32 accumulation.
    h2 = jnp.dot(h1.astype(jnp.bfloat16), w2_ref[...],
                 preferred_element_type=jnp.float32) + b2_ref[...]
    h2 = jnp.maximum(h2, 0.0)

    # Layer 3 (N=1): VPU multiply + cross-lane reduce instead of a near-empty
    # MXU matmul. w3_ref is the [1, 300] weight row in f32.
    out_ref[...] = jnp.sum(h2 * w3_ref[...], axis=-1, keepdims=True) + b3_ref[...]


def cln_forward(s, a, params, *, block_b=256):
    """Pallas forward pass for CLN.

    s: [B, state_dim] float32
    a: [B, action_dim] float32
    params: dict with
        w1_s [state_dim, 400] bf16, w1_a [action_dim, 400] bf16, b1 [1, 400] f32,
        w2   [400, 300]      bf16, b2 [1, 300] f32,
        w3   [1, 300]        f32,  b3 [1, 1]   f32
    returns collision_prob (pre-sigmoid logit, like the torch module): [B, 1] f32
    """
    B, state_dim = s.shape
    action_dim = a.shape[1]

    # Batch tile: multiple of 8 sublanes; 256 rows at training batch sizes to
    # fill the 256-wide MXU on v6e/v7x while staying well inside scoped VMEM.
    TB = min(block_b, _round_up(B, 8))
    Bp = _round_up(B, TB)
    if Bp != B:
        s = jnp.pad(s, ((0, Bp - B), (0, 0)))
        a = jnp.pad(a, ((0, Bp - B), (0, 0)))

    def const_spec(arr):
        # Full-array block, same block index every grid step -> weights stay
        # resident in VMEM (DMA'd once, not per batch tile).
        return pl.BlockSpec(arr.shape, lambda i: (0, 0))

    out = pl.pallas_call(
        cln_kernel,
        out_shape=jax.ShapeDtypeStruct((Bp, 1), jnp.float32),
        grid=(Bp // TB,),
        in_specs=[
            pl.BlockSpec((TB, state_dim), lambda i: (i, 0)),
            pl.BlockSpec((TB, action_dim), lambda i: (i, 0)),
            const_spec(params["w1_s"]),
            const_spec(params["w1_a"]),
            const_spec(params["b1"]),
            const_spec(params["w2"]),
            const_spec(params["b2"]),
            const_spec(params["w3"]),
            const_spec(params["b3"]),
        ],
        out_specs=pl.BlockSpec((TB, 1), lambda i: (i, 0)),
        compiler_params=pltpu.CompilerParams(
            dimension_semantics=("parallel",)),  # v7x: shard batch tiles over 2 TCs
    )(s, a, params["w1_s"], params["w1_a"], params["b1"],
      params["w2"], params["b2"], params["w3"], params["b3"])

    return out[:B] if Bp != B else out


def init_cln_params(key, state_dim, action_dim):
    """Init mimicking PyTorch nn.Linear default (uniform +-1/sqrt(fan_in)).

    Matmul weights are stored transposed to [in, out] and in bf16 (MXU-native,
    halves weight DMA bytes). Biases and the final weight row stay f32.
    """
    def linear(k, fi, fo):
        kw, kb = jax.random.split(k)
        bound = 1.0 / (fi ** 0.5)
        w = jax.random.uniform(kw, (fi, fo), jnp.float32, minval=-bound, maxval=bound)
        b = jax.random.uniform(kb, (1, fo), jnp.float32, minval=-bound, maxval=bound)
        return w, b

    d_in = state_dim + action_dim
    k1, k2, k3 = jax.random.split(key, 3)
    w1, b1 = linear(k1, d_in, 400)
    w2, b2 = linear(k2, 400, 300)
    w3, b3 = linear(k3, 300, 1)
    # TODO(synk): hidden sizes 400/300 pad to 512/384 lanes; if the model def can
    # change, 512/384 (multiples of 128) would remove the MXU lane-padding waste.
    return {
        "w1_s": w1[:state_dim].astype(jnp.bfloat16),
        "w1_a": w1[state_dim:].astype(jnp.bfloat16),
        "b1": b1,
        "w2": w2.astype(jnp.bfloat16),
        "b2": b2,
        "w3": w3.T,          # [1, 300] f32 row for the VPU/XLU reduction
        "b3": b3,
    }


if __name__ == "__main__":
    # Shapes consistent with the TD3 velodyne setup: state_dim=24, action_dim=2.
    batch, state_dim, action_dim = 4, 24, 2

    key = jax.random.PRNGKey(0)
    k_s, k_a, k_p = jax.random.split(key, 3)
    s = jax.random.normal(k_s, (batch, state_dim), jnp.float32)
    a = jax.random.normal(k_a, (batch, action_dim), jnp.float32)
    params = init_cln_params(k_p, state_dim, action_dim)

    collision_prob = cln_forward(s, a, params)
    jax.block_until_ready(collision_prob)

    # Correctness check against a plain f32 JAX reference of the original module
    # (loose tolerance accounts for bf16 matmul operands in the kernel).
    w1_full = jnp.concatenate(
        [params["w1_s"].astype(jnp.float32), params["w1_a"].astype(jnp.float32)], axis=0)
    x = jnp.concatenate([s, a], axis=1)
    h1 = jnp.maximum(x @ w1_full + params["b1"], 0.0)
    h2 = jnp.maximum(h1 @ params["w2"].astype(jnp.float32) + params["b2"], 0.0)
    ref = h2 @ params["w3"].T + params["b3"]

    assert collision_prob.shape == (batch, 1)
    assert jnp.allclose(collision_prob, ref, atol=5e-2, rtol=5e-2)

    print("KERNEL_OK")
</pallas_src>

<mosaic_0001>
module attributes {stable_mosaic.version = 11 : i64} {
  func.func @cln_kernel(%arg0: i32, %arg1: memref<8x24xf32, #tpu.memory_space<vmem>>, %arg2: memref<8x2xf32, #tpu.memory_space<vmem>>, %arg3: memref<24x400xbf16, #tpu.memory_space<vmem>>, %arg4: memref<2x400xbf16, #tpu.memory_space<vmem>>, %arg5: memref<1x400xf32, #tpu.memory_space<vmem>>, %arg6: memref<400x300xbf16, #tpu.memory_space<vmem>>, %arg7: memref<1x300xf32, #tpu.memory_space<vmem>>, %arg8: memref<1x300xf32, #tpu.memory_space<vmem>>, %arg9: memref<1x1xf32, #tpu.memory_space<vmem>>, %arg10: memref<8x1xf32, #tpu.memory_space<vmem>>) attributes {dimension_semantics = [#tpu.dimension_semantics<parallel>], iteration_bounds = array<i64: 1>, scalar_prefetch = 0 : i64, scratch_operands = 0 : i64, tpu.core_type = #tpu.core_type<tc>, window_params = [{transform_indices = @transform_0, window_bounds = array<i64: 8, 24>}, {transform_indices = @transform_1, window_bounds = array<i64: 8, 2>}, {pipeline_mode = #tpu.pipeline_mode<synchronous>, transform_indices = @transform_2, window_bounds = array<i64: 24, 400>}, {pipeline_mode = #tpu.pipeline_mode<synchronous>, transform_indices = @transform_3, window_bounds = array<i64: 2, 400>}, {pipeline_mode = #tpu.pipeline_mode<synchronous>, transform_indices = @transform_4, window_bounds = array<i64: 1, 400>}, {pipeline_mode = #tpu.pipeline_mode<synchronous>, transform_indices = @transform_5, window_bounds = array<i64: 400, 300>}, {pipeline_mode = #tpu.pipeline_mode<synchronous>, transform_indices = @transform_6, window_bounds = array<i64: 1, 300>}, {pipeline_mode = #tpu.pipeline_mode<synchronous>, transform_indices = @transform_7, window_bounds = array<i64: 1, 300>}, {pipeline_mode = #tpu.pipeline_mode<synchronous>, transform_indices = @transform_8, window_bounds = array<i64: 1, 1>}, {transform_indices = @transform_9, window_bounds = array<i64: 8, 1>}]} {
    %c0 = arith.constant 0 : index
    %c0_0 = arith.constant 0 : index
    %0 = vector.load %arg1[%c0, %c0_0] : memref<8x24xf32, #tpu.memory_space<vmem>>, vector<8x24xf32>
    %1 = arith.truncf %0 : vector<8x24xf32> to vector<8x24xbf16>
    %c0_1 = arith.constant 0 : index
    %c0_2 = arith.constant 0 : index
    %2 = vector.load %arg2[%c0_1, %c0_2] : memref<8x2xf32, #tpu.memory_space<vmem>>, vector<8x2xf32>
    %3 = arith.truncf %2 : vector<8x2xf32> to vector<8x2xbf16>
    %c0_3 = arith.constant 0 : index
    %c0_4 = arith.constant 0 : index
    %4 = vector.load %arg3[%c0_3, %c0_4] : memref<24x400xbf16, #tpu.memory_space<vmem>>, vector<24x400xbf16>
    %cst = arith.constant dense<0.000000e+00> : vector<8x400xf32>
    %5 = tpu.matmul %1, %4, %cst {dimension_numbers = #tpu.dot_dimension_numbers<[1], [0], [0], [1], [0, 0, 1, 1], [], []>} : vector<8x24xbf16>, vector<24x400xbf16>, vector<8x400xf32> -> vector<8x400xf32>
    %c0_5 = arith.constant 0 : index
    %c0_6 = arith.constant 0 : index
    %6 = vector.load %arg4[%c0_5, %c0_6] : memref<2x400xbf16, #tpu.memory_space<vmem>>, vector<2x400xbf16>
    %cst_7 = arith.constant dense<0.000000e+00> : vector<8x400xf32>
    %7 = tpu.matmul %3, %6, %cst_7 {dimension_numbers = #tpu.dot_dimension_numbers<[1], [0], [0], [1], [0, 0, 1, 1], [], []>} : vector<8x2xbf16>, vector<2x400xbf16>, vector<8x400xf32> -> vector<8x400xf32>
    %8 = arith.addf %5, %7 : vector<8x400xf32>
    %c0_8 = arith.constant 0 : index
    %c0_9 = arith.constant 0 : index
    %9 = vector.load %arg5[%c0_8, %c0_9] : memref<1x400xf32, #tpu.memory_space<vmem>>, vector<1x400xf32>
    %10 = vector.broadcast %9 : vector<1x400xf32> to vector<8x400xf32>
    %11 = arith.addf %8, %10 : vector<8x400xf32>
    %cst_10 = arith.constant 0.000000e+00 : f32
    %12 = vector.broadcast %cst_10 : f32 to vector<8x400xf32>
    %13 = arith.maximumf %11, %12 : vector<8x400xf32>
    %14 = arith.truncf %13 : vector<8x400xf32> to vector<8x400xbf16>
    %c0_11 = arith.constant 0 : index
    %c0_12 = arith.constant 0 : index
    %15 = vector.load %arg6[%c0_11, %c0_12] : memref<400x300xbf16, #tpu.memory_space<vmem>>, vector<400x300xbf16>
    %cst_13 = arith.constant dense<0.000000e+00> : vector<8x300xf32>
    %16 = tpu.matmul %14, %15, %cst_13 {dimension_numbers = #tpu.dot_dimension_numbers<[1], [0], [0], [1], [0, 0, 1, 1], [], []>} : vector<8x400xbf16>, vector<400x300xbf16>, vector<8x300xf32> -> vector<8x300xf32>
    %c0_14 = arith.constant 0 : index
    %c0_15 = arith.constant 0 : index
    %17 = vector.load %arg7[%c0_14, %c0_15] : memref<1x300xf32, #tpu.memory_space<vmem>>, vector<1x300xf32>
    %18 = vector.broadcast %17 : vector<1x300xf32> to vector<8x300xf32>
    %19 = arith.addf %16, %18 : vector<8x300xf32>
    %cst_16 = arith.constant 0.000000e+00 : f32
    %20 = vector.broadcast %cst_16 : f32 to vector<8x300xf32>
    %21 = arith.maximumf %19, %20 : vector<8x300xf32>
    %c0_17 = arith.constant 0 : index
    %c0_18 = arith.constant 0 : index
    %22 = vector.load %arg8[%c0_17, %c0_18] : memref<1x300xf32, #tpu.memory_space<vmem>>, vector<1x300xf32>
    %23 = vector.broadcast %22 : vector<1x300xf32> to vector<8x300xf32>
    %24 = arith.mulf %21, %23 : vector<8x300xf32>
    %cst_19 = arith.constant dense<0.000000e+00> : vector<8xf32>
    %25 = vector.multi_reduction <add>, %24, %cst_19 [1] : vector<8x300xf32> to vector<8xf32>
    %26 = vector.shape_cast %25 : vector<8xf32> to vector<8x1xf32>
    %c0_20 = arith.constant 0 : index
    %c0_21 = arith.constant 0 : index
    %27 = vector.load %arg9[%c0_20, %c0_21] : memref<1x1xf32, #tpu.memory_space<vmem>>, vector<1x1xf32>
    %28 = vector.broadcast %27 : vector<1x1xf32> to vector<8x1xf32>
    %29 = arith.addf %26, %28 : vector<8x1xf32>
    %c0_22 = arith.constant 0 : index
    %c0_23 = arith.constant 0 : index
    %30 = vector.load %arg10[%c0_22, %c0_23] : memref<8x1xf32, #tpu.memory_space<vmem>>, vector<8x1xf32>
    tpu.vector_store %arg10[%c0_22, %c0_23], %29 {strides = array<i32>} : memref<8x1xf32, #tpu.memory_space<vmem>>, vector<8x1xf32>,
    return
  }
  func.func @transform_0(%arg0: i32) -> (i32, i32) {
    %c0_i32 = arith.constant 0 : i32
    %c0_i32_0 = arith.constant 0 : i32
    return %arg0, %c0_i32 : i32, i32
  }
  func.func @transform_1(%arg0: i32) -> (i32, i32) {
    %c0_i32 = arith.constant 0 : i32
    %c0_i32_0 = arith.constant 0 : i32
    return %arg0, %c0_i32 : i32, i32
  }
  func.func @transform_2(%arg0: i32) -> (i32, i32) {
    %c0_i32 = arith.constant 0 : i32
    %c0_i32_0 = arith.constant 0 : i32
    %c0_i32_1 = arith.constant 0 : i32
    return %c0_i32, %c0_i32_0 : i32, i32
  }
  func.func @transform_3(%arg0: i32) -> (i32, i32) {
    %c0_i32 = arith.constant 0 : i32
    %c0_i32_0 = arith.constant 0 : i32
    %c0_i32_1 = arith.constant 0 : i32
    return %c0_i32, %c0_i32_0 : i32, i32
  }
  func.func @transform_4(%arg0: i32) -> (i32, i32) {
    %c0_i32 = arith.constant 0 : i32
    %c0_i32_0 = arith.constant 0 : i32
    %c0_i32_1 = arith.constant 0 : i32
    return %c0_i32, %c0_i32_0 : i32, i32
  }
  func.func @transform_5(%arg0: i32) -> (i32, i32) {
    %c0_i32 = arith.constant 0 : i32
    %c0_i32_0 = arith.constant 0 : i32
    %c0_i32_1 = arith.constant 0 : i32
    return %c0_i32, %c0_i32_0 : i32, i32
  }
  func.func @transform_6(%arg0: i32) -> (i32, i32) {
    %c0_i32 = arith.constant 0 : i32
    %c0_i32_0 = arith.constant 0 : i32
    %c0_i32_1 = arith.constant 0 : i32
    return %c0_i32, %c0_i32_0 : i32, i32
  }
  func.func @transform_7(%arg0: i32) -> (i32, i32) {
    %c0_i32 = arith.constant 0 : i32
    %c0_i32_0 = arith.constant 0 : i32
    %c0_i32_1 = arith.constant 0 : i32
    return %c0_i32, %c0_i32_0 : i32, i32
  }
  func.func @transform_8(%arg0: i32) -> (i32, i32) {
    %c0_i32 = arith.constant 0 : i32
    %c0_i32_0 = arith.constant 0 : i32
    %c0_i32_1 = arith.constant 0 : i32
    return %c0_i32, %c0_i32_0 : i32, i32
  }
  func.func @transform_9(%arg0: i32) -> (i32, i32) {
    %c0_i32 = arith.constant 0 : i32
    %c0_i32_0 = arith.constant 0 : i32
    return %arg0, %c0_i32 : i32, i32
  }
}

</mosaic_0001>

<bundles_post_ra>
// kernel: tpu_custom_call.1
= control target key start
LH: loop header
LB: loop body
LE: loop exit
PB: predicated region body
PF: predicated region fallthrough
CT: control target
= control target key end

     0   :  { %s1535_s0 = inlined_call_operand.vmem [shape: f32[8,24], index: 0, kind: input, shape index: {}]   ;;  %s1536_s1 = inlined_call_operand.vmem [shape: f32[8,2], index: 1, kind: input, shape index: {}]   ;;  %s1537_s2 = inlined_call_operand.hbm [shape: bf16[24,400], index: 2, kind: input, shape index: {}]   ;;  %s1538_s3 = inlined_call_operand.vmem [shape: bf16[2,400], index: 3, kind: input, shape index: {}]   ;;  %s1539_s4 = inlined_call_operand.vmem [shape: f32[1,400], index: 4, kind: input, shape index: {}]   ;;  %s1540_s5 = inlined_call_operand.hbm [shape: bf16[400,300], index: 5, kind: input, shape index: {}]   ;;  %s1541_s6 = inlined_call_operand.vmem [shape: f32[1,300], index: 6, kind: input, shape index: {}]   ;;  %s1542_s7 = inlined_call_operand.vmem [shape: f32[1,300], index: 7, kind: input, shape index: {}]   ;;  %s1543_s8 = inlined_call_operand.<no memory space> [shape: f32[1,1], index: 8, kind: input, shape index: {}]   ;;  %s1544_s9 = inlined_call_operand.vmem [shape: f32[8,1], index: 9, kind: output, shape index: {}]  }
   0x1   :  { %v14_v0 = vstv %s1543_s8 }
   0x2   :  { %15 = vst [vmem:[#allocation2] sm:$0x1] %v14_v0 }
   0x3   :  { %16 = vsyncpa [#allocation4], 0 }
   0x4   :  { %17 = vsyncpa [#allocation6], 0  ;;  %s1378_s11 = smov [#allocation3]   ;;  %s1330_s15 = scalar_lea.hbm %s1537_s2, 768 }
   0x5   :  { %s27_s12 = sshll.u32 %s1378_s11, 4  ;;  %p1331_p0 = scmp.ne.s32.totalorder %s1537_s2, %s1330_s15  ;;  %s28_s12 = int_to_ptr.vmem [resolvable:$true] %s27_s12 }
   0x6   :  { %p1334_p1 = scmp.lt.u32.totalorder %s1330_s15, %s1537_s2 }
   0x8   :  { %p1336_p2 = pnand %p1334_p1, %p1331_p0 }
   0xa   :  { %1339 = shalt.err (!%p1336_p2)
}
   0xb   :  { %s1340_s8 = scalar_lea.vmem %s28_s12, 768  ;;  %p1345_p4 = scmp.lt.s32.totalorder %s28_s12, %s28_s12 }
   0xc   :  { %p1341_p3 = scmp.ne.s32.totalorder %s28_s12, %s1340_s8  ;;  %p1346_p5 = scmp.lt.s32.totalorder %s1340_s8, %s1340_s8 }
   0xe   :  { %p1347_p6 = por %p1346_p5, %p1345_p4 }
  0x10   :  { %p1348_p7 = pnand %p1347_p6, %p1341_p3 }
  0x12   :  { %1351 = shalt.err (!%p1348_p7)
}
  0x13   :  { %s1379_s20 = smov 256   ;;  %s1380_s21 = smov 16  }
  0x14   :  { %33 = dma.hbm_to_vmem [thread:$0]  %s1537_s2, 768, %s28_s12, [#allocation4], %s1379_s20, %s1379_s20, %s1380_s21  }
  0x15   :  { %s1381_s24 = smov [#allocation5]   ;;  %s1352_s28 = scalar_lea.hbm %s1540_s5, 9600 }
  0x16   :  { %s43_s25 = sshll.u32 %s1381_s24, 4  ;;  %p1353_p8 = scmp.ne.s32.totalorder %s1540_s5, %s1352_s28  ;;  %s44_s25 = int_to_ptr.vmem [resolvable:$true] %s43_s25 }
  0x17   :  { %p1356_p9 = scmp.lt.u32.totalorder %s1352_s28, %s1540_s5 }
  0x19   :  { %p1358_p10 = pnand %p1356_p9, %p1353_p8 }
  0x1b   :  { %1361 = shalt.err (!%p1358_p10)
}
  0x1c   :  { %s1362_s13 = scalar_lea.vmem %s44_s25, 9600  ;;  %p1367_p12 = scmp.lt.s32.totalorder %s44_s25, %s44_s25 }
  0x1d   :  { %p1363_p11 = scmp.ne.s32.totalorder %s44_s25, %s1362_s13  ;;  %p1368_p13 = scmp.lt.s32.totalorder %s1362_s13, %s1362_s13 }
  0x1f   :  { %p1369_p0 = por %p1368_p13, %p1367_p12 }
  0x21   :  { %p1370_p1 = pnand %p1369_p0, %p1363_p11 }
  0x23   :  { %1373 = shalt.err (!%p1370_p1)
}
  0x24   :  { %s1382_s2 = smov 192   ;;  %s1383_s12 = smov 12  }
  0x25   :  { %49 = dma.hbm_to_vmem [thread:$0]  %s1540_s5, 9600, %s44_s25, [#allocation6], %s1382_s2, %s1382_s2, %s1383_s12  }
  0x26   :  { %1374 = dma.done.wait [#allocation4], 768  }
  0x27   :  { %1375 = vsyncadd [#allocation4], 4294966528 }
  0x28   :  { %1376 = dma.done.wait [#allocation6], 9600  }
  0x29   :  { %1377 = vsyncadd [#allocation6], 4294957696  ;;  %v86_v1 = vlaneseq  ;;  %v1384_v2 = vmov 1966171168   ;;  %v1385_v4 = vmov 0   ;;  %vm103_vm0 = vcmask 1040384  }
  0x2a   :  { %v84_v3 = vunpack.c.l.s4 %v1384_v2  ;;  %148 = vmatprep.mubr.bf16.mxu1 %v1385_v4  ;;  %v1089_v8 = vld.sshfl [vmem:[%s1538_s3] sm:$0x33 pattern:$0x75316420]  ;;  %vm99_vm1 = vcmask 15360   ;;  %vm232_vm2 = vcmask 1043456  }
  0x2b   :  { %v1464_v5 = vshrl.u32 %v86_v1, 7  ;;  %v82_v9 = vcombine.high %v1089_v8, %v1089_v8  ;;  %v65_v11 = vld [vmem:[%s1536_s1] sm:$0xff]  ;;  %v1233_v19 = vld [vmem:[#allocation5 + $0x1c] ss:$12 sps:$4 sm:$0xff]   ;;  %v1235_v22 = vld [vmem:[#allocation5 + $0x18] ss:$12 sps:$4 sm:$0xff]  }
  0x2c   :  { %v85_v6 = vunpack.c.0.s8 %v84_v3  ;;  %v66_v16 = vpack.c.bf16 %v65_v11, %v65_v11  ;;  %v1230_v17 = vld [vmem:[#allocation5 + $0x4] ss:$12 sps:$4 sm:$0xff]   ;;  %v1232_v18 = vld [vmem:[#allocation5] ss:$12 sps:$4 sm:$0xff]   ;;  %v1241_v31 = vld [vmem:[#allocation5 + $0x48] ss:$12 sps:$4 sm:$0xff]  }
  0x2d   :  { %v1222_v21 = vld [vmem:[#allocation3 + $0x4] ss:$16 sps:$4 sm:$0xff]   ;;  %882 = vmatprep.subr.bf16.mxu0 %v1230_v17  ;;  %v1238_v25 = vld [vmem:[#allocation5 + $0x30] ss:$12 sps:$4 sm:$0xff]   ;;  %v1239_v26 = vld [vmem:[#allocation5 + $0x4c] ss:$12 sps:$4 sm:$0xff]  }
  0x2e   :  { %v88_v7 = vsub.s32 %v85_v6, %v1464_v5  ;;  %883 = vmatpush1.bf16.msra.mxu0 %v1232_v18  ;;  %v1236_v23 = vld [vmem:[#allocation5 + $0x34] ss:$12 sps:$4 sm:$0xff]   ;;  %v1242_v32 = vld [vmem:[#allocation5 + $0x64] ss:$12 sps:$4 sm:$0xff]   ;;  %v1227_v33 = vld [vmem:[#allocation3 + $0xc] ss:$16 sps:$4 sm:$0xff]  }
  0x2f   :  { %884 = vmatprep.subr.bf16.mxu0 %v1233_v19  ;;  %v71_v24 = vld [vmem:[#allocation3 + $0x20] sm:$0xff]  ;;  %v1225_v35 = vld [vmem:[#allocation3 + $0x8] ss:$16 sps:$4 sm:$0xff]   ;;  %v1244_v37 = vld [vmem:[#allocation5 + $0x60] ss:$12 sps:$4 sm:$0xff]   ;;  %vm228_vm3 = vcmask 195584  }
  0x30   :  { %v89_v10 = vrot.slane %v1089_v8, %v88_v7  ;;  %v96_v12 = vrot.slane %v82_v9, %v88_v7  ;;  %v1220_v27 = vld [vmem:[#allocation3] ss:$16 sps:$4 sm:$0xff]   ;;  %v1099_v28 = vcombine.high %v71_v24, %v71_v24  ;;  %v1098_v29 = vcombine.low %v71_v24, %v71_v24  ;;  %v72_v36 = vld [vmem:[#allocation3 + $0x28] sm:$0xff]  ;;  %v1256_v44 = vld [vmem:[#allocation5 + $0xc8] ss:$12 sps:$4 sm:$0xff]  }
  0x31   :  { %v63_v30 = vld [vmem:[%s1535_s0] sm:$0xff]  ;;  %v1245_v39 = vld [vmem:[#allocation5 + $0x7c] ss:$12 sps:$4 sm:$0xff]   ;;  %v1247_v40 = vld [vmem:[#allocation5 + $0x78] ss:$12 sps:$4 sm:$0xff]   ;;  %v1101_v41 = vcombine.high %v72_v36, %v72_v36  ;;  %v1100_v42 = vcombine.low %v72_v36, %v72_v36  ;;  %vm878_vm4 = vcmask 130048  }
  0x32   :  { %v97_v13 = vcombine.high %v89_v10, %v89_v10  ;;  %v105_v14 = vsel %vm103_vm0, %v89_v10, 0  ;;  %v98_v15 = vcombine.high %v96_v12, %v96_v12  ;;  %1090 = vmatprep.subr.msk.bf16.mxu1 %vm103_vm0, %v96_v12  ;;  %885 = vmatpush1.bf16.msra.mxu0 %v1235_v22  ;;  %v234_v34 = vsel %vm232_vm2, %v1098_v29, 0  ;;  %v1248_v43 = vld [vmem:[#allocation5 + $0x94] ss:$12 sps:$4 sm:$0xff]   ;;  %v1250_v45 = vld [vmem:[#allocation5 + $0x90] ss:$12 sps:$4 sm:$0xff]  }
  0x33   :  { %117 = vmatpush1.bf16.msra.mxu1 %v105_v14  ;;  %886 = vmatprep.subr.bf16.mxu0 %v1236_v23  ;;  %v64_v38 = vpack.c.bf16 %v63_v30, %v63_v30  ;;  %v240_v46 = vsel %vm232_vm2, %v1100_v42, 0  ;;  %v1251_v47 = vld [vmem:[#allocation5 + $0xac] ss:$12 sps:$4 sm:$0xff]   ;;  %v1258_v48 = vld [vmem:[#allocation5 + $0x8] ss:$12 sps:$4 sm:$0xff]   ;;  %v1501_v29 = vsub.s32 1, %v1464_v5 }
  0x34   :  { %1092 = vmatprep.subr.msk.bf16.mxu1 %vm103_vm0, %v98_v15  ;;  %v111_v20 = vsel %vm103_vm0, %v97_v13, 0  ;;  %v1261_v49 = vld [vmem:[#allocation5 + $0xe0] ss:$12 sps:$4 sm:$0xff]   ;;  %v1253_v50 = vld [vmem:[#allocation5 + $0xa8] ss:$12 sps:$4 sm:$0xff]   ;;  %vm1068_vm5 = vcmask 359424  }
  0x35   :  { %v1254_v51 = vld [vmem:[#allocation5 + $0xc4] ss:$12 sps:$4 sm:$0xff]   ;;  %v1263_v52 = vld [vmem:[#allocation5 + $0x20] ss:$12 sps:$4 sm:$0xff]   ;;  %v1259_v54 = vld [vmem:[#allocation5 + $0xdc] ss:$12 sps:$4 sm:$0xff]  }
  0x36   :  { %1091 = vmatmul.mubr.msk.bf16.vlgmr.msra.gmra.mrb[0].mxu1 %vm99_vm1, %v66_v16  ;;  %887 = vmatpush1.bf16.msra.mxu0 %v1238_v25  ;;  %v1257_v53 = vld [vmem:[#allocation5 + $0xc0] ss:$12 sps:$4 sm:$0xff]   ;;  %v1262_v55 = vld [vmem:[#allocation5 + $0xd8] ss:$12 sps:$4 sm:$0xff]   ;;  %v1267_v58 = vld [vmem:[#allocation5 + $0xf0] ss:$12 sps:$4 sm:$0xff]  }
  0x37   :  { %158 = vmatpush1.bf16.msra.mxu1 %v111_v20  ;;  %189 = vmatprep.mubr.bf16.mxu1 %v1385_v4  ;;  %v1264_v56 = vld [vmem:[#allocation5 + $0xf4] ss:$12 sps:$4 sm:$0xff]   ;;  %v1266_v57 = vld [vmem:[#allocation5 + $0xf8] ss:$12 sps:$4 sm:$0xff]   ;;  %v1271_v61 = vld [vmem:[#allocation5 + $0x110] ss:$12 sps:$4 sm:$0xff]  }
  0x38   :  { %245 = vmatprep.subr.bf16.mxu1 %v1222_v21  ;;  %888 = vmatprep.subr.bf16.mxu0 %v1239_v26  ;;  %v1268_v59 = vld [vmem:[#allocation5 + $0x38] ss:$12 sps:$4 sm:$0xff]   ;;  %v1272_v62 = vld [vmem:[#allocation5 + $0x108] ss:$12 sps:$4 sm:$0xff]   ;;  %v1273_v63 = vld [vmem:[#allocation5 + $0x50] ss:$12 sps:$4 sm:$0xff]  }
  0x39   :  { %v1269_v60 = vld [vmem:[#allocation5 + $0x10c] ss:$12 sps:$4 sm:$0xff]   ;;  %v1274_v0 = vld [vmem:[#allocation5 + $0x124] ss:$12 sps:$4 sm:$0xff]   ;;  %v1276_v1 = vld [vmem:[#allocation5 + $0x128] ss:$12 sps:$4 sm:$0xff]  }
  0x3a   :  { %889 = vmatpush1.bf16.msra.mxu0 %v1241_v31  ;;  %v1277_v2 = vld [vmem:[#allocation5 + $0x120] ss:$12 sps:$4 sm:$0xff]   ;;  %v1278_v3 = vld [vmem:[#allocation5 + $0x68] ss:$12 sps:$4 sm:$0xff]   ;;  %v1282_v8 = vld [vmem:[#allocation5 + $0x138] ss:$12 sps:$4 sm:$0xff]  }
  0x3b   :  { %890 = vmatprep.subr.bf16.mxu0 %v1242_v32  ;;  %v1279_v6 = vld [vmem:[#allocation5 + $0x13c] ss:$12 sps:$4 sm:$0xff]   ;;  %v1281_v7 = vld [vmem:[#allocation5 + $0x140] ss:$12 sps:$4 sm:$0xff]   ;;  %v1286_v11 = vld [vmem:[#allocation5 + $0x158] ss:$12 sps:$4 sm:$0xff]  }
  0x3c   :  { %v1283_v9 = vld [vmem:[#allocation5 + $0x80] ss:$12 sps:$4 sm:$0xff]   ;;  %v1287_v12 = vld [vmem:[#allocation5 + $0x150] ss:$12 sps:$4 sm:$0xff]   ;;  %v1288_v13 = vld [vmem:[#allocation5 + $0x98] ss:$12 sps:$4 sm:$0xff]  }
  0x3d   :  { %v1284_v10 = vld [vmem:[#allocation5 + $0x154] ss:$12 sps:$4 sm:$0xff]   ;;  %v1289_v14 = vld [vmem:[#allocation5 + $0x16c] ss:$12 sps:$4 sm:$0xff]   ;;  %v1291_v15 = vld [vmem:[#allocation5 + $0x170] ss:$12 sps:$4 sm:$0xff]  }
  0x3e   :  { %1093 = vmatmul.mubr.msk.bf16.vlgmr.msra.gmra.mrb[4].mxu1 %vm99_vm1, %v66_v16  ;;  %891 = vmatpush1.bf16.msra.mxu0 %v1244_v37  ;;  %v1292_v16 = vld [vmem:[#allocation5 + $0x168] ss:$12 sps:$4 sm:$0xff]   ;;  %v1293_v17 = vld [vmem:[#allocation5 + $0xb0] ss:$12 sps:$4 sm:$0xff]   ;;  %vm1081_vm6 = vcmask 7168  }
  0x3f   :  { %246 = vmatpush1.bf16.msra.mxu1 %v1220_v27  ;;  %277 = vmatprep.mubr.bf16.mxu1 %v1385_v4  ;;  %v1296_v18 = vld [vmem:[#allocation5 + $0x184] ss:$12 sps:$4 sm:$0xff]   ;;  %v1493_v27 = vsub.s32 0, %v1464_v5 }
  0x40   :  { %1102 = vmatprep.subr.msk.bf16.mxu1 %vm232_vm2, %v1099_v28  ;;  %892 = vmatprep.subr.bf16.mxu0 %v1245_v39  ;;  %v1498_v28 = vld [vmem:[%s1539_s4] sm:$0xf]  ;;  %v343_v39 = vsub.s32 3, %v1464_v5 }
  0x41   :  { %v332_v30 = vrot.slane %v1498_v28, %v1493_v27  ;;  %v336_v32 = vrot.slane %v1498_v28, %v1501_v29 }
  0x42   :  { %893 = vmatpush1.bf16.msra.mxu0 %v1247_v40 }
  0x43   :  { %248 = vmatpush1.bf16.msra.mxu1 %v234_v34  ;;  %894 = vmatprep.subr.bf16.mxu0 %v1248_v43 }
  0x44   :  { %286 = vmatprep.subr.bf16.mxu1 %v1227_v33 }
  0x46   :  { %1103 = vmatmul.mubr.msk.bf16.vlgmr.msra.gmra.mrb[8].mxu1 %vm228_vm3, %v64_v38  ;;  %895 = vmatpush1.bf16.msra.mxu0 %v1250_v45 }
  0x47   :  { %287 = vmatpush1.bf16.msra.mxu1 %v1225_v35  ;;  %318 = vmatprep.mubr.bf16.mxu1 %v1385_v4 }
  0x48   :  { %1104 = vmatprep.subr.msk.bf16.mxu1 %vm232_vm2, %v1101_v41  ;;  %896 = vmatprep.subr.bf16.mxu0 %v1251_v47  ;;  %v1297_v47 = vld [vmem:[#allocation5 + $0x188] ss:$12 sps:$4 sm:$0xff]  }
  0x4a   :  { %897 = vmatpush1.bf16.msra.mxu0 %v1253_v50 }
  0x4b   :  { %289 = vmatpush1.bf16.msra.mxu1 %v240_v46  ;;  %898 = vmatprep.subr.bf16.mxu0 %v1254_v51  ;;  %v1294_v46 = vld [vmem:[#allocation5 + $0x180] ss:$12 sps:$4 sm:$0xff]   ;;  %v1300_v51 = vld [vmem:[#allocation5 + $0x19c] ss:$12 sps:$4 sm:$0xff]  }
  0x4c   :  { %1184 = vmatprep.subr.bf16.mxu1 %v1256_v44  ;;  %v344_v44 = vrot.slane %v1498_v28, %v343_v39 }
  0x4e   :  { %1105 = vmatmul.mubr.msk.bf16.vlgmr.msra.gmra.mrb[12].mxu1 %vm228_vm3, %v64_v38  ;;  %899 = vmatpush1.bf16.msra.mxu0 %v1257_v53 }
  0x4f   :  { %1185 = vmatpush3.bf16.msra.mxu1 %v1258_v48  ;;  %900 = vmatprep.subr.bf16.mxu0 %v1259_v54 }
  0x50   :  { %1186 = vmatprep.subr.bf16.mxu1 %v1261_v49 }
  0x52   :  { %901 = vmatpush1.bf16.msra.mxu0 %v1262_v55 }
  0x53   :  { %1187 = vmatpush3.bf16.msra.mxu1 %v1263_v52  ;;  %902 = vmatprep.subr.bf16.mxu0 %v1264_v56  ;;  %v1298_v56 = vld [vmem:[#allocation5 + $0x198] ss:$12 sps:$4 sm:$0xff]  }
  0x54   :  { %1188 = vmatprep.subr.bf16.mxu1 %v1266_v57  ;;  %v1301_v57 = vld [vmem:[#allocation5 + $0x1a0] ss:$12 sps:$4 sm:$0xff]  }
  0x56   :  { %903 = vmatpush1.bf16.msra.mxu0 %v1267_v58  ;;  %v1304_v58 = vld [vmem:[#allocation5 + $0x1b4] ss:$12 sps:$4 sm:$0xff]  }
  0x57   :  { %1189 = vmatpush3.bf16.msra.mxu1 %v1268_v59  ;;  %904 = vmatprep.subr.bf16.mxu0 %v1269_v60 }
  0x58   :  { %1190 = vmatprep.subr.bf16.mxu1 %v1271_v61  ;;  %v1302_v61 = vld [vmem:[#allocation5 + $0x1b0] ss:$12 sps:$4 sm:$0xff]  }
  0x5a   :  { %905 = vmatpush1.bf16.msra.mxu0 %v1272_v62  ;;  %v1305_v62 = vld [vmem:[#allocation5 + $0x1b8] ss:$12 sps:$4 sm:$0xff]  }
  0x5b   :  { %1191 = vmatpush3.bf16.msra.mxu1 %v1273_v63  ;;  %906 = vmatprep.subr.bf16.mxu0 %v1274_v0  ;;  %v1308_v63 = vld [vmem:[#allocation5 + $0x1cc] ss:$12 sps:$4 sm:$0xff]   ;;  %v1306_v0 = vld [vmem:[#allocation5 + $0x1c8] ss:$12 sps:$4 sm:$0xff]  }
  0x5c   :  { %1192 = vmatprep.subr.bf16.mxu1 %v1276_v1  ;;  %v1309_v1 = vld [vmem:[#allocation5 + $0x1d0] ss:$12 sps:$4 sm:$0xff]  }
  0x5e   :  { %907 = vmatpush1.bf16.msra.mxu0 %v1277_v2  ;;  %v1312_v2 = vld [vmem:[#allocation5 + $0x1e4] ss:$12 sps:$4 sm:$0xff]  }
  0x5f   :  { %1193 = vmatpush3.bf16.msra.mxu1 %v1278_v3  ;;  %908 = vmatprep.subr.bf16.mxu0 %v1279_v6  ;;  %v1310_v3 = vld [vmem:[#allocation5 + $0x1e0] ss:$12 sps:$4 sm:$0xff]   ;;  %v1313_v6 = vld [vmem:[#allocation5 + $0x1e8] ss:$12 sps:$4 sm:$0xff]  }
  0x60   :  { %1194 = vmatprep.subr.bf16.mxu1 %v1281_v7  ;;  %v1316_v7 = vld [vmem:[#allocation5 + $0x1fc] ss:$12 sps:$4 sm:$0xff]  }
  0x62   :  { %909 = vmatpush1.bf16.msra.mxu0 %v1282_v8  ;;  %v1314_v8 = vld [vmem:[#allocation5 + $0x1f8] ss:$12 sps:$4 sm:$0xff]  }
  0x63   :  { %1195 = vmatpush3.bf16.msra.mxu1 %v1283_v9  ;;  %910 = vmatprep.subr.bf16.mxu0 %v1284_v10  ;;  %v1317_v9 = vld [vmem:[#allocation5 + $0x200] ss:$12 sps:$4 sm:$0xff]   ;;  %v339_v10 = vsub.s32 2, %v1464_v5 }
  0x64   :  { %1196 = vmatprep.subr.bf16.mxu1 %v1286_v11  ;;  %v1320_v11 = vld [vmem:[#allocation5 + $0x214] ss:$12 sps:$4 sm:$0xff]  }
  0x66   :  { %911 = vmatpush1.bf16.msra.mxu0 %v1287_v12  ;;  %v1318_v12 = vld [vmem:[#allocation5 + $0x210] ss:$12 sps:$4 sm:$0xff]  }
  0x67   :  { %1197 = vmatpush3.bf16.msra.mxu1 %v1288_v13  ;;  %912 = vmatprep.subr.bf16.mxu0 %v1289_v14  ;;  %v1321_v13 = vld [vmem:[#allocation5 + $0x218] ss:$12 sps:$4 sm:$0xff]   ;;  %v340_v14 = vrot.slane %v1498_v28, %v339_v10 }
  0x68   :  { %1198 = vmatprep.subr.bf16.mxu1 %v1291_v15  ;;  %v1324_v15 = vld [vmem:[#allocation5 + $0x22c] ss:$12 sps:$4 sm:$0xff]  }
  0x6a   :  { %913 = vmatpush1.bf16.msra.mxu0 %v1292_v16  ;;  %v1322_v16 = vld [vmem:[#allocation5 + $0x228] ss:$12 sps:$4 sm:$0xff]  }
  0x6b   :  { %1199 = vmatpush3.bf16.msra.mxu1 %v1293_v17  ;;  %923 = vmatprep.subr.bf16.mxu0 %v1296_v18  ;;  %v1325_v17 = vld [vmem:[#allocation5 + $0x230] ss:$12 sps:$4 sm:$0xff]  }
  0x6c   :  { %1004 = vmatprep.subr.bf16.mxu1 %v1385_v4  ;;  %v1328_v18 = vld [vmem:[#allocation5 + $0x244] ss:$12 sps:$4 sm:$0xff]  }
 0x109   :  { %v150_v19 = vpop.f32.mrb[0].mxu1 }
 0x10a   :  { %v152_v20 = vpop.f32.mrb[1].mxu1 }
 0x10b   :  { %v154_v21 = vpop.f32.mrb[2].mxu1 }
 0x10c   :  { %v155_v22 = vpop.f32.mrb[3].mxu1 }
 0x111   :  { %v191_v23 = vpop.f32.mrb[4].mxu1 }
 0x112   :  { %v193_v24 = vpop.f32.mrb[5].mxu1 }
 0x113   :  { %v195_v25 = vpop.f32.mrb[6].mxu1 }
 0x114   :  { %v196_v26 = vpop.f32.mrb[7].mxu1 }
 0x119   :  { %v279_v31 = vpop.f32.mrb[8].mxu1 }
 0x11a   :  { %v280_v33 = vadd.f32 %v279_v31, %v150_v19  ;;  %v281_v34 = vpop.f32.mrb[9].mxu1  ;;  %v1326_v19 = vld [vmem:[#allocation5 + $0x240] ss:$12 sps:$4 sm:$0xff]  }
 0x11b   :  { %v282_v35 = vadd.f32 %v281_v34, %v152_v20  ;;  %v283_v36 = vpop.f32.mrb[10].mxu1  ;;  %v1329_v20 = vld [vmem:[#allocation5 + $0x248] ss:$12 sps:$4 sm:$0xff]  }
 0x11c   :  { %v349_v37 = vadd.f32 %v332_v30, %v280_v33  ;;  %v284_v38 = vpop.f32.mrb[11].mxu1  ;;  %v461_v30 = vld [vmem:[%s1541_s6] sm:$0x7] }
 0x11d   :  { %v350_v40 = vadd.f32 %v336_v32, %v282_v35  ;;  %v474_v31 = vrot.slane %v461_v30, %v339_v10  ;;  %v466_v32 = vrot.slane %v461_v30, %v1493_v27  ;;  %v470_v33 = vrot.slane %v461_v30, %v1501_v29 }
 0x11e   :  { %v353_v41 = vmax.f32 %v349_v37, 0.0 }
 0x11f   :  { %v354_v42 = vmax.f32 %v350_v40, 0.0 }
 0x120   :  { %v357_v48 = vpack.c.bf16 %v353_v41, %v353_v41 }
 0x121   :  { %v320_v43 = vpop.f32.mrb[12].mxu1  ;;  %v358_v45 = vpack.c.bf16 %v354_v42, %v354_v42 }
 0x122   :  { %v1509_v49 = vadd.f32 %v320_v43, %v191_v23  ;;  %v322_v50 = vpop.f32.mrb[13].mxu1 }
 0x123   :  { %v323_v52 = vadd.f32 %v322_v50, %v193_v24  ;;  %914 = vmatprep.mubr.bf16.mxu0 %v358_v45  ;;  %996 = vmatprep.mubr.bf16.mxu1 %v358_v45  ;;  %v324_v53 = vpop.f32.mrb[14].mxu1 }
 0x124   :  { %915 = vmatmul.mubr.bf16.vlgmr.msra.gmra.mrb[0].mxu0 %v357_v48  ;;  %997 = vmatmul.mubr.bf16.vlgmr.msra.gmra.mrb[16].mxu1 %v357_v48  ;;  %v325_v54 = vpop.f32.mrb[15].mxu1  ;;  %v351_v5 = vadd.f32 %v340_v14, %v1509_v49 }
 0x125   :  { %v352_v55 = vadd.f32 %v344_v44, %v323_v52  ;;  %924 = vmatpush1.bf16.msra.mxu0 %v1294_v46  ;;  %1005 = vmatpush1.bf16.msra.mxu1 %v1297_v47 }
 0x126   :  { %925 = vmatprep.subr.bf16.mxu0 %v1300_v51  ;;  %1006 = vmatprep.subr.bf16.mxu1 %v1385_v4  ;;  %v355_v21 = vmax.f32 %v351_v5, 0.0 }
 0x127   :  { %v356_v59 = vmax.f32 %v352_v55, 0.0 }
 0x128   :  { %v359_v22 = vpack.c.bf16 %v355_v21, %v355_v21 }
 0x129   :  { %v360_v60 = vpack.c.bf16 %v356_v59, %v356_v59  ;;  %926 = vmatpush1.bf16.msra.mxu0 %v1298_v56  ;;  %1007 = vmatpush1.bf16.msra.mxu1 %v1301_v57  ;;  %v1183_v57 = vld [vmem:[#allocation2] ss:$0 sm:$0xff] }
 0x12a   :  { %927 = vmatprep.subr.bf16.mxu0 %v1304_v58  ;;  %1008 = vmatprep.subr.bf16.mxu1 %v1385_v4 }
 0x12b   :  { %1181 = vmatprep.mubr.msk.bf16.mxu0 %vm878_vm4, %v360_v60  ;;  %1182 = vmatprep.mubr.msk.bf16.mxu1 %vm878_vm4, %v360_v60 }
 0x12d   :  { %928 = vmatpush1.bf16.msra.mxu0 %v1302_v61  ;;  %1009 = vmatpush1.bf16.msra.mxu1 %v1305_v62 }
 0x12e   :  { %929 = vmatprep.subr.bf16.mxu0 %v1308_v63  ;;  %1010 = vmatprep.subr.bf16.mxu1 %v1385_v4 }
 0x131   :  { %930 = vmatpush1.bf16.msra.mxu0 %v1306_v0  ;;  %1011 = vmatpush1.bf16.msra.mxu1 %v1309_v1 }
 0x132   :  { %931 = vmatprep.subr.bf16.mxu0 %v1312_v2  ;;  %1012 = vmatprep.subr.bf16.mxu1 %v1385_v4 }
 0x135   :  { %932 = vmatpush1.bf16.msra.mxu0 %v1310_v3  ;;  %1013 = vmatpush1.bf16.msra.mxu1 %v1313_v6 }
 0x136   :  { %933 = vmatprep.subr.bf16.mxu0 %v1316_v7  ;;  %1014 = vmatprep.subr.bf16.mxu1 %v1385_v4 }
 0x139   :  { %934 = vmatpush1.bf16.msra.mxu0 %v1314_v8  ;;  %1015 = vmatpush1.bf16.msra.mxu1 %v1317_v9 }
 0x13a   :  { %935 = vmatprep.subr.bf16.mxu0 %v1320_v11  ;;  %1016 = vmatprep.subr.bf16.mxu1 %v1385_v4 }
 0x13d   :  { %936 = vmatpush1.bf16.msra.mxu0 %v1318_v12  ;;  %1017 = vmatpush1.bf16.msra.mxu1 %v1321_v13 }
 0x13e   :  { %937 = vmatprep.subr.bf16.mxu0 %v1324_v15  ;;  %1018 = vmatprep.subr.bf16.mxu1 %v1385_v4 }
 0x141   :  { %938 = vmatpush1.bf16.msra.mxu0 %v1322_v16  ;;  %1019 = vmatpush1.bf16.msra.mxu1 %v1325_v17 }
 0x142   :  { %939 = vmatprep.subr.bf16.mxu0 %v1328_v18  ;;  %1020 = vmatprep.subr.bf16.mxu1 %v1385_v4  ;;  %v1047_v4 = vld [vmem:[%s1542_s7] sm:$0x7] }
 0x143   :  { %v1052_v38 = vrot.slane %v1047_v4, %v1493_v27  ;;  %v1060_v42 = vrot.slane %v1047_v4, %v339_v10  ;;  %v1056_v44 = vrot.slane %v1047_v4, %v1501_v29 }
 0x145   :  { %940 = vmatpush1.bf16.msra.mxu0 %v1326_v19  ;;  %1021 = vmatpush1.bf16.msra.mxu1 %v1329_v20 }
 0x148   :  { %956 = vmatmul.mubr.bf16.vlgmr.msra.gmra.mrb[0].mxu0 %v359_v22  ;;  %1037 = vmatmul.mubr.bf16.vlgmr.msra.gmra.mrb[20].mxu1 %v359_v22 }
 0x1f7   :  { %v1200_v23 = vpop.f32.mrb[16].mxu1 }
 0x1f8   :  { %v1201_v24 = vpop.f32.mrb[17].mxu1 }
 0x1f9   :  { %v1202_v25 = vadd.f32 %v1201_v24, %v1200_v23  ;;  %v1203_v26 = vpop.f32.mrb[18].mxu1 }
 0x1fa   :  { %v1204_v28 = vpop.f32.mrb[19].mxu1 }
 0x1fb   :  { %v999_v34 = vadd.f32 %v1202_v25, %v474_v31 }
 0x21b   :  { %v957_v35 = vpop.f32.mrb[0].mxu0  ;;  %v1038_v36 = vpop.f32.mrb[20].mxu1 }
 0x21c   :  { %v1206_v37 = vadd.f32 %v957_v35, %v466_v32  ;;  %v1039_v39 = vadd.f32 %v1038_v36, %v999_v34  ;;  %v959_v40 = vpop.f32.mrb[1].mxu0  ;;  %v1040_v41 = vpop.f32.mrb[21].mxu1 }
 0x21d   :  { %v1207_v43 = vadd.f32 %v959_v40, %v470_v33  ;;  %v961_v45 = vpop.f32.mrb[2].mxu0  ;;  %v1041_v46 = vpop.f32.mrb[22].mxu1 }
 0x21e   :  { %v1044_v47 = vmax.f32 %v1206_v37, 0.0  ;;  %v1046_v48 = vmax.f32 %v1039_v39, 0.0  ;;  %v962_v49 = vpop.f32.mrb[3].mxu0  ;;  %v1042_v50 = vpop.f32.mrb[23].mxu1 }
 0x21f   :  { %v1045_v51 = vmax.f32 %v1207_v43, 0.0 }
 0x220   :  { %v1064_v52 = vmul.f32 %v1052_v38, %v1044_v47  ;;  %v1066_v53 = vmul.f32 %v1060_v42, %v1046_v48 }
 0x221   :  { %v1065_v54 = vmul.f32 %v1056_v44, %v1045_v51 }
 0x222   :  { %v1069_v27 = vsel %vm1068_vm5, %v1066_v53, 0.0 }
 0x223   :  { %v1067_v55 = vadd.f32 %v1065_v54, %v1064_v52 }
 0x225   :  { %v1070_v56 = vadd.f32 %v1069_v27, %v1067_v55 }
 0x227   :  { %1071 = vadd.xlane.f32.xlu0 %v1070_v56 }
 0x2b4   :  { %v1072_v58 = vpop.xlane.xlu0 %1071 }
 0x2b5   :  { %v1080_v59 = vadd.f32 %v1183_v57, %v1072_v58 }
 0x2b7   :  { %1082 = vst.msk [vmem:[%s1544_s9] sm:$0xff] %vm1081_vm6, %v1080_v59 }
 0x2b8   :  { %1087 = vsyncpa [#allocation4], 1 }
 0x2b9   :  { %1088 = vsyncpa [#allocation6], 1 }

</bundles_post_ra>
